<compile_context>
chip_gen: v7x
topology: tpu7x:2x2x1
jax: 0.10.0
libtpu: 0.0.40
codegen_flags: <defaults>
</compile_context>

<pallas_src>
import functools
import math

import numpy as np
import jax
import jax.numpy as jnp
from jax.experimental import pallas as pl
from jax.experimental.pallas import tpu as pltpu

HIDDEN_SIZE = 256
NUM_HEADS = 4
HEAD_DIM = HIDDEN_SIZE // NUM_HEADS  # 64
LN_EPS = 1e-6


def _layer_norm(x, gamma, beta):
    mean = jnp.mean(x, axis=-1, keepdims=True)
    var = jnp.mean((x - mean) ** 2, axis=-1, keepdims=True)
    return (x - mean) * jax.lax.rsqrt(var + LN_EPS) * gamma + beta


def cross_attn_kernel(q_ref, kt_ref, v_ref,
                      ws_ref, uk_ref, wvo_ref, bias_ref, mask_ref,
                      lng_ref, lnb_ref, wfc1_ref, bfc1_ref, ln1g_ref, ln1b_ref,
                      out_ref, *, mq, mk, dq, dk):
    f32 = jnp.float32
    q = q_ref[...]                     # (Mq, Dq)   batch merged into M
    kt = kt_ref[...]                   # (Dk, Mk)   keys pre-transposed in the wrapper
    v = v_ref[...]                     # (Mk, Dk)

    # Three wide MXU pushes replace 12 tiny per-head projection matmuls.
    qw = jnp.dot(q, ws_ref[...], preferred_element_type=f32)    # (Mq, H*Dk)  bilinear q side
    kb = jnp.dot(uk_ref[...], kt, preferred_element_type=f32)   # (H, Mk)     key-side bias
    vo = jnp.dot(v, wvo_ref[...], preferred_element_type=f32)   # (Mk, H*Dq)  V + out-proj fused

    # Per-head scores; stacked along sublanes (16-row offsets -> pure vreg placement).
    s_blocks = []
    for h in range(NUM_HEADS):
        s_h = jnp.dot(qw[:, h * dk:(h + 1) * dk], kt,
                      preferred_element_type=f32)                # (Mq, Mk)
        s_blocks.append(s_h + kb[h:h + 1, :])
    s = jnp.concatenate(s_blocks, axis=0) + mask_ref[...]        # (H*Mq, Mk) + additive mask

    # Single softmax over all heads. Exact reciprocal (divide) — approx recip broke tolerance.
    s = s - jnp.max(s, axis=-1, keepdims=True)
    p = jnp.exp(s)
    p = p / jnp.sum(p, axis=-1, keepdims=True)
    # TODO(synk): MHA attn dropout p=0.5 and self.dropout are identity in eval mode.

    # Context + fused out-projection, accumulated per head (residual + all biases in init).
    ctx = [jnp.dot(p[h * mq:(h + 1) * mq, :], vo[:, h * dq:(h + 1) * dq],
                   preferred_element_type=f32) for h in range(NUM_HEADS)]
    acc = (q + bias_ref[...]) + ((ctx[0] + ctx[1]) + (ctx[2] + ctx[3]))

    skip = jnp.maximum(acc, 0.0)
    skip = _layer_norm(skip, lng_ref[...], lnb_ref[...])

    new = jnp.dot(skip, wfc1_ref[...], preferred_element_type=f32) + bfc1_ref[...]
    new = jnp.maximum(new + skip, 0.0)
    out_ref[...] = _layer_norm(new, ln1g_ref[...], ln1b_ref[...]).astype(out_ref.dtype)


@jax.jit
def cross_attention_forward(query_i, key_i, value_i, params):
    B, Lq, Dq = query_i.shape
    _, Lk, Dk = key_i.shape
    H, hd = NUM_HEADS, HEAD_DIM
    p = params
    scale = 1.0 / math.sqrt(hd)

    # --- wrapper-side constant folding (weights only; would be done once offline) ---
    wq_f = (p["wq"] @ p["wiq"]) * scale                 # (Dq, 256)  fc_q ∘ in_proj_q, scaled
    bq_f = (p["bq"] @ p["wiq"] + p["biq"]) * scale      # (1, 256)
    wk_f = p["wk"] @ p["wik"]                           # (Dk, 256)  fc_k ∘ in_proj_k
    # (bk_f is dropped: q-side x k-bias cross terms are row-constant under the row softmax.)
    wv_f = p["wv"] @ p["wiv"]                           # (Dk, 256)  fc_v ∘ in_proj_v
    bv_f = p["bv"] @ p["wiv"] + p["biv"]                # (1, 256)
    wofc = p["wo"] @ p["wfc"]                           # (256, Dq)  out_proj ∘ fc
    bofc = p["bo"] @ p["wfc"] + p["bfc"]                # (1, Dq)

    wq_h = wq_f.reshape(Dq, H, hd)
    bq_h = bq_f.reshape(1, H, hd)
    wk_h = wk_f.reshape(Dk, H, hd)
    wv_h = wv_f.reshape(Dk, H, hd)
    bv_h = bv_f.reshape(1, H, hd)
    wofc_h = wofc.reshape(H, hd, Dq)

    # Bilinear score weights (K-projection eliminated from the kernel).
    ws_all = jnp.concatenate([wq_h[:, h] @ wk_h[:, h].T for h in range(H)], axis=1)  # (Dq, H*Dk)
    uk_all = jnp.concatenate([bq_h[:, h] @ wk_h[:, h].T for h in range(H)], axis=0)  # (H, Dk)

    # V-path / out-projection fusion; V biases folded into the output bias (softmax rows sum to 1).
    wvo_all = jnp.concatenate([wv_h[:, h] @ wofc_h[h] for h in range(H)], axis=1)    # (Dk, H*Dq)
    bias_tot = bofc + sum(bv_h[:, h] @ wofc_h[h] for h in range(H))                  # (1, Dq)

    # Static block-diagonal additive mask for the merged batch (compile-time constant).
    mq, mk = B * Lq, B * Lk
    rows = (np.arange(H * mq)[:, None] % mq) // Lq
    cols = np.arange(mk)[None, :] // Lk
    mask = jnp.asarray(np.where(rows == cols, 0.0, -1e30).astype(np.float32))        # (H*Mq, Mk)

    args = (
        query_i.reshape(mq, Dq),           # batch merged into M
        key_i.reshape(mk, Dk).T,           # keys pre-transposed: (Dk, Mk)
        value_i.reshape(mk, Dk),
        ws_all, uk_all, wvo_all, bias_tot, mask,
        p["lng"], p["lnb"], p["wfc1"], p["bfc1"], p["ln1g"], p["ln1b"],
    )

    vmem = pl.BlockSpec(memory_space=pltpu.MemorySpace.VMEM)
    kernel = functools.partial(cross_attn_kernel, mq=mq, mk=mk, dq=Dq, dk=Dk)
    out_flat = pl.pallas_call(
        kernel,
        out_shape=jax.ShapeDtypeStruct((mq, Dq), query_i.dtype),
        in_specs=[vmem] * len(args),
        out_specs=vmem,
    )(*args)
    return out_flat.reshape(B, Lq, Dq)


def init_params(key, hidden_dim_q, hidden_dim_k):
    """Deterministic synthetic parameters (same shapes as the nn.Module, weights as (in, out))."""
    names_shapes = {
        "wq": (hidden_dim_q, HIDDEN_SIZE), "bq": (1, HIDDEN_SIZE),
        "wk": (hidden_dim_k, HIDDEN_SIZE), "bk": (1, HIDDEN_SIZE),
        "wv": (hidden_dim_k, HIDDEN_SIZE), "bv": (1, HIDDEN_SIZE),
        "wiq": (HIDDEN_SIZE, HIDDEN_SIZE), "biq": (1, HIDDEN_SIZE),
        "wik": (HIDDEN_SIZE, HIDDEN_SIZE), "bik": (1, HIDDEN_SIZE),
        "wiv": (HIDDEN_SIZE, HIDDEN_SIZE), "biv": (1, HIDDEN_SIZE),
        "wo": (HIDDEN_SIZE, HIDDEN_SIZE), "bo": (1, HIDDEN_SIZE),
        "wfc": (HIDDEN_SIZE, hidden_dim_q), "bfc": (1, hidden_dim_q),
        "lng": (1, hidden_dim_q), "lnb": (1, hidden_dim_q),
        "wfc1": (hidden_dim_q, hidden_dim_q), "bfc1": (1, hidden_dim_q),
        "ln1g": (1, hidden_dim_q), "ln1b": (1, hidden_dim_q),
    }
    keys = jax.random.split(key, len(names_shapes))
    params = {}
    for k_i, (name, shape) in zip(keys, names_shapes.items()):
        if name in ("lng", "ln1g"):
            params[name] = jnp.ones(shape, jnp.float32)
        elif name in ("lnb", "ln1b"):
            params[name] = jnp.zeros(shape, jnp.float32)
        elif name.startswith("b"):
            params[name] = 0.01 * jax.random.normal(k_i, shape, jnp.float32)
        else:
            fan_in = shape[0]
            params[name] = jax.random.normal(k_i, shape, jnp.float32) / math.sqrt(fan_in)
    return params


def reference_forward(query_i, key_i, value_i, p):
    """Pure-JAX reference matching PyTorch eval-mode semantics (unfused weights)."""
    def ln(x, g, b):
        m = jnp.mean(x, -1, keepdims=True)
        v = jnp.mean((x - m) ** 2, -1, keepdims=True)
        return (x - m) / jnp.sqrt(v + LN_EPS) * g + b

    B, Lq, _ = query_i.shape
    Lk = key_i.shape[1]
    q = query_i @ p["wq"] + p["bq"]
    k = key_i @ p["wk"] + p["bk"]
    v = value_i @ p["wv"] + p["bv"]

    qp = (q @ p["wiq"] + p["biq"]).reshape(B, Lq, NUM_HEADS, HEAD_DIM).transpose(0, 2, 1, 3)
    kp = (k @ p["wik"] + p["bik"]).reshape(B, Lk, NUM_HEADS, HEAD_DIM).transpose(0, 2, 1, 3)
    vp = (v @ p["wiv"] + p["biv"]).reshape(B, Lk, NUM_HEADS, HEAD_DIM).transpose(0, 2, 1, 3)
    s = jnp.einsum("bhqd,bhkd->bhqk", qp, kp) / math.sqrt(HEAD_DIM)
    a = jax.nn.softmax(s, axis=-1)
    o = jnp.einsum("bhqk,bhkd->bhqd", a, vp).transpose(0, 2, 1, 3).reshape(B, Lq, HIDDEN_SIZE)
    cross = o @ p["wo"] + p["bo"]

    skip = cross @ p["wfc"] + p["bfc"] + query_i
    skip = jax.nn.relu(skip)
    skip = ln(skip, p["lng"], p["lnb"])
    new = skip @ p["wfc1"] + p["bfc1"] + skip
    new = jax.nn.relu(new)
    return ln(new, p["ln1g"], p["ln1b"])


if __name__ == "__main__":
    B, Lq, Lk = 2, 8, 16
    hidden_dim_q, hidden_dim_k = 32, 48

    root = jax.random.PRNGKey(0)
    k_q, k_k, k_v, k_p = jax.random.split(root, 4)
    query_i = jax.random.normal(k_q, (B, Lq, hidden_dim_q), jnp.float32)
    key_i = jax.random.normal(k_k, (B, Lk, hidden_dim_k), jnp.float32)
    value_i = jax.random.normal(k_v, (B, Lk, hidden_dim_k), jnp.float32)
    params = init_params(k_p, hidden_dim_q, hidden_dim_k)

    out = jax.block_until_ready(cross_attention_forward(query_i, key_i, value_i, params))
    ref = jax.block_until_ready(reference_forward(query_i, key_i, value_i, params))

    max_err = float(jnp.max(jnp.abs(out - ref)))
    assert out.shape == (B, Lq, hidden_dim_q)
    # Exact softmax division + f32 matmuls: the only error left is weight-fold reassociation
    # (typically ~1e-5 here); 1e-3 still flags any real fusion bug.
    assert max_err < 1e-3, f"mismatch vs reference: {max_err}"
    print("KERNEL_OK")
</pallas_src>

<mosaic_0001>
module attributes {stable_mosaic.version = 11 : i64} {
  func.func @cross_attn_kernel(%arg0: memref<16x32xf32, #tpu.memory_space<vmem>>, %arg1: memref<48x32xf32, #tpu.memory_space<vmem>>, %arg2: memref<32x48xf32, #tpu.memory_space<vmem>>, %arg3: memref<32x192xf32, #tpu.memory_space<vmem>>, %arg4: memref<4x48xf32, #tpu.memory_space<vmem>>, %arg5: memref<48x128xf32, #tpu.memory_space<vmem>>, %arg6: memref<1x32xf32, #tpu.memory_space<vmem>>, %arg7: memref<64x32xf32, #tpu.memory_space<vmem>>, %arg8: memref<1x32xf32, #tpu.memory_space<vmem>>, %arg9: memref<1x32xf32, #tpu.memory_space<vmem>>, %arg10: memref<32x32xf32, #tpu.memory_space<vmem>>, %arg11: memref<1x32xf32, #tpu.memory_space<vmem>>, %arg12: memref<1x32xf32, #tpu.memory_space<vmem>>, %arg13: memref<1x32xf32, #tpu.memory_space<vmem>>, %arg14: memref<16x32xf32, #tpu.memory_space<vmem>>) attributes {dimension_semantics = [], scalar_prefetch = 0 : i64, scratch_operands = 0 : i64, tpu.core_type = #tpu.core_type<tc>} {
    %c0 = arith.constant 0 : index
    %c0_0 = arith.constant 0 : index
    %0 = vector.load %arg0[%c0, %c0_0] : memref<16x32xf32, #tpu.memory_space<vmem>>, vector<16x32xf32>
    %c0_1 = arith.constant 0 : index
    %c0_2 = arith.constant 0 : index
    %1 = vector.load %arg1[%c0_1, %c0_2] : memref<48x32xf32, #tpu.memory_space<vmem>>, vector<48x32xf32>
    %c0_3 = arith.constant 0 : index
    %c0_4 = arith.constant 0 : index
    %2 = vector.load %arg2[%c0_3, %c0_4] : memref<32x48xf32, #tpu.memory_space<vmem>>, vector<32x48xf32>
    %c0_5 = arith.constant 0 : index
    %c0_6 = arith.constant 0 : index
    %3 = vector.load %arg3[%c0_5, %c0_6] : memref<32x192xf32, #tpu.memory_space<vmem>>, vector<32x192xf32>
    %cst = arith.constant dense<0.000000e+00> : vector<16x192xf32>
    %4 = tpu.matmul %0, %3, %cst {dimension_numbers = #tpu.dot_dimension_numbers<[1], [0], [0], [1], [0, 0, 1, 1], [], []>} : vector<16x32xf32>, vector<32x192xf32>, vector<16x192xf32> -> vector<16x192xf32>
    %c0_7 = arith.constant 0 : index
    %c0_8 = arith.constant 0 : index
    %5 = vector.load %arg4[%c0_7, %c0_8] : memref<4x48xf32, #tpu.memory_space<vmem>>, vector<4x48xf32>
    %cst_9 = arith.constant dense<0.000000e+00> : vector<4x32xf32>
    %6 = tpu.matmul %5, %1, %cst_9 {dimension_numbers = #tpu.dot_dimension_numbers<[1], [0], [0], [1], [0, 0, 1, 1], [], []>} : vector<4x48xf32>, vector<48x32xf32>, vector<4x32xf32> -> vector<4x32xf32>
    %c0_10 = arith.constant 0 : index
    %c0_11 = arith.constant 0 : index
    %7 = vector.load %arg5[%c0_10, %c0_11] : memref<48x128xf32, #tpu.memory_space<vmem>>, vector<48x128xf32>
    %cst_12 = arith.constant dense<0.000000e+00> : vector<32x128xf32>
    %8 = tpu.matmul %2, %7, %cst_12 {dimension_numbers = #tpu.dot_dimension_numbers<[1], [0], [0], [1], [0, 0, 1, 1], [], []>} : vector<32x48xf32>, vector<48x128xf32>, vector<32x128xf32> -> vector<32x128xf32>
    %9 = vector.extract_strided_slice %4 {offsets = [0, 0], sizes = [16, 48], strides = [1, 1]} : vector<16x192xf32> to vector<16x48xf32>
    %cst_13 = arith.constant dense<0.000000e+00> : vector<16x32xf32>
    %10 = tpu.matmul %9, %1, %cst_13 {dimension_numbers = #tpu.dot_dimension_numbers<[1], [0], [0], [1], [0, 0, 1, 1], [], []>} : vector<16x48xf32>, vector<48x32xf32>, vector<16x32xf32> -> vector<16x32xf32>
    %11 = vector.extract_strided_slice %6 {offsets = [0, 0], sizes = [1, 32], strides = [1, 1]} : vector<4x32xf32> to vector<1x32xf32>
    %12 = vector.broadcast %11 : vector<1x32xf32> to vector<16x32xf32>
    %13 = arith.addf %10, %12 : vector<16x32xf32>
    %14 = vector.extract_strided_slice %4 {offsets = [0, 48], sizes = [16, 48], strides = [1, 1]} : vector<16x192xf32> to vector<16x48xf32>
    %cst_14 = arith.constant dense<0.000000e+00> : vector<16x32xf32>
    %15 = tpu.matmul %14, %1, %cst_14 {dimension_numbers = #tpu.dot_dimension_numbers<[1], [0], [0], [1], [0, 0, 1, 1], [], []>} : vector<16x48xf32>, vector<48x32xf32>, vector<16x32xf32> -> vector<16x32xf32>
    %16 = vector.extract_strided_slice %6 {offsets = [1, 0], sizes = [1, 32], strides = [1, 1]} : vector<4x32xf32> to vector<1x32xf32>
    %17 = vector.broadcast %16 : vector<1x32xf32> to vector<16x32xf32>
    %18 = arith.addf %15, %17 : vector<16x32xf32>
    %19 = vector.extract_strided_slice %4 {offsets = [0, 96], sizes = [16, 48], strides = [1, 1]} : vector<16x192xf32> to vector<16x48xf32>
    %cst_15 = arith.constant dense<0.000000e+00> : vector<16x32xf32>
    %20 = tpu.matmul %19, %1, %cst_15 {dimension_numbers = #tpu.dot_dimension_numbers<[1], [0], [0], [1], [0, 0, 1, 1], [], []>} : vector<16x48xf32>, vector<48x32xf32>, vector<16x32xf32> -> vector<16x32xf32>
    %21 = vector.extract_strided_slice %6 {offsets = [2, 0], sizes = [1, 32], strides = [1, 1]} : vector<4x32xf32> to vector<1x32xf32>
    %22 = vector.broadcast %21 : vector<1x32xf32> to vector<16x32xf32>
    %23 = arith.addf %20, %22 : vector<16x32xf32>
    %24 = vector.extract_strided_slice %4 {offsets = [0, 144], sizes = [16, 48], strides = [1, 1]} : vector<16x192xf32> to vector<16x48xf32>
    %cst_16 = arith.constant dense<0.000000e+00> : vector<16x32xf32>
    %25 = tpu.matmul %24, %1, %cst_16 {dimension_numbers = #tpu.dot_dimension_numbers<[1], [0], [0], [1], [0, 0, 1, 1], [], []>} : vector<16x48xf32>, vector<48x32xf32>, vector<16x32xf32> -> vector<16x32xf32>
    %26 = vector.extract_strided_slice %6 {offsets = [3, 0], sizes = [1, 32], strides = [1, 1]} : vector<4x32xf32> to vector<1x32xf32>
    %27 = vector.broadcast %26 : vector<1x32xf32> to vector<16x32xf32>
    %28 = arith.addf %25, %27 : vector<16x32xf32>
    %29 = tpu.concatenate %13, %18, %23, %28 in 0 : vector<16x32xf32>, vector<16x32xf32>, vector<16x32xf32>, vector<16x32xf32> -> vector<64x32xf32>
    %c0_17 = arith.constant 0 : index
    %c0_18 = arith.constant 0 : index
    %30 = vector.load %arg7[%c0_17, %c0_18] : memref<64x32xf32, #tpu.memory_space<vmem>>, vector<64x32xf32>
    %31 = arith.addf %29, %30 : vector<64x32xf32>
    %cst_19 = arith.constant dense<0xFF800000> : vector<64xf32>
    %32 = vector.multi_reduction <maximumf>, %31, %cst_19 [1] : vector<64x32xf32> to vector<64xf32>
    %33 = vector.shape_cast %32 : vector<64xf32> to vector<64x1xf32>
    %34 = vector.broadcast %33 : vector<64x1xf32> to vector<64x32xf32>
    %35 = arith.subf %31, %34 : vector<64x32xf32>
    %36 = math.exp %35 : vector<64x32xf32>
    %cst_20 = arith.constant dense<0.000000e+00> : vector<64xf32>
    %37 = vector.multi_reduction <add>, %36, %cst_20 [1] : vector<64x32xf32> to vector<64xf32>
    %38 = vector.shape_cast %37 : vector<64xf32> to vector<64x1xf32>
    %39 = vector.broadcast %38 : vector<64x1xf32> to vector<64x32xf32>
    %40 = arith.divf %36, %39 : vector<64x32xf32>
    %41 = vector.extract_strided_slice %40 {offsets = [0, 0], sizes = [16, 32], strides = [1, 1]} : vector<64x32xf32> to vector<16x32xf32>
    %42 = vector.extract_strided_slice %8 {offsets = [0, 0], sizes = [32, 32], strides = [1, 1]} : vector<32x128xf32> to vector<32x32xf32>
    %cst_21 = arith.constant dense<0.000000e+00> : vector<16x32xf32>
    %43 = tpu.matmul %41, %42, %cst_21 {dimension_numbers = #tpu.dot_dimension_numbers<[1], [0], [0], [1], [0, 0, 1, 1], [], []>} : vector<16x32xf32>, vector<32x32xf32>, vector<16x32xf32> -> vector<16x32xf32>
    %44 = vector.extract_strided_slice %40 {offsets = [16, 0], sizes = [16, 32], strides = [1, 1]} : vector<64x32xf32> to vector<16x32xf32>
    %45 = vector.extract_strided_slice %8 {offsets = [0, 32], sizes = [32, 32], strides = [1, 1]} : vector<32x128xf32> to vector<32x32xf32>
    %cst_22 = arith.constant dense<0.000000e+00> : vector<16x32xf32>
    %46 = tpu.matmul %44, %45, %cst_22 {dimension_numbers = #tpu.dot_dimension_numbers<[1], [0], [0], [1], [0, 0, 1, 1], [], []>} : vector<16x32xf32>, vector<32x32xf32>, vector<16x32xf32> -> vector<16x32xf32>
    %47 = vector.extract_strided_slice %40 {offsets = [32, 0], sizes = [16, 32], strides = [1, 1]} : vector<64x32xf32> to vector<16x32xf32>
    %48 = vector.extract_strided_slice %8 {offsets = [0, 64], sizes = [32, 32], strides = [1, 1]} : vector<32x128xf32> to vector<32x32xf32>
    %cst_23 = arith.constant dense<0.000000e+00> : vector<16x32xf32>
    %49 = tpu.matmul %47, %48, %cst_23 {dimension_numbers = #tpu.dot_dimension_numbers<[1], [0], [0], [1], [0, 0, 1, 1], [], []>} : vector<16x32xf32>, vector<32x32xf32>, vector<16x32xf32> -> vector<16x32xf32>
    %50 = vector.extract_strided_slice %40 {offsets = [48, 0], sizes = [16, 32], strides = [1, 1]} : vector<64x32xf32> to vector<16x32xf32>
    %51 = vector.extract_strided_slice %8 {offsets = [0, 96], sizes = [32, 32], strides = [1, 1]} : vector<32x128xf32> to vector<32x32xf32>
    %cst_24 = arith.constant dense<0.000000e+00> : vector<16x32xf32>
    %52 = tpu.matmul %50, %51, %cst_24 {dimension_numbers = #tpu.dot_dimension_numbers<[1], [0], [0], [1], [0, 0, 1, 1], [], []>} : vector<16x32xf32>, vector<32x32xf32>, vector<16x32xf32> -> vector<16x32xf32>
    %c0_25 = arith.constant 0 : index
    %c0_26 = arith.constant 0 : index
    %53 = vector.load %arg6[%c0_25, %c0_26] : memref<1x32xf32, #tpu.memory_space<vmem>>, vector<1x32xf32>
    %54 = vector.broadcast %53 : vector<1x32xf32> to vector<16x32xf32>
    %55 = arith.addf %0, %54 : vector<16x32xf32>
    %56 = arith.addf %43, %46 : vector<16x32xf32>
    %57 = arith.addf %49, %52 : vector<16x32xf32>
    %58 = arith.addf %56, %57 : vector<16x32xf32>
    %59 = arith.addf %55, %58 : vector<16x32xf32>
    %cst_27 = arith.constant 0.000000e+00 : f32
    %60 = vector.broadcast %cst_27 : f32 to vector<16x32xf32>
    %61 = arith.maximumf %59, %60 : vector<16x32xf32>
    %c0_28 = arith.constant 0 : index
    %c0_29 = arith.constant 0 : index
    %62 = vector.load %arg8[%c0_28, %c0_29] : memref<1x32xf32, #tpu.memory_space<vmem>>, vector<1x32xf32>
    %c0_30 = arith.constant 0 : index
    %c0_31 = arith.constant 0 : index
    %63 = vector.load %arg9[%c0_30, %c0_31] : memref<1x32xf32, #tpu.memory_space<vmem>>, vector<1x32xf32>
    %cst_32 = arith.constant dense<0.000000e+00> : vector<16xf32>
    %64 = vector.multi_reduction <add>, %61, %cst_32 [1] : vector<16x32xf32> to vector<16xf32>
    %65 = vector.shape_cast %64 : vector<16xf32> to vector<16x1xf32>
    %cst_33 = arith.constant 3.200000e+01 : f32
    %66 = vector.broadcast %cst_33 : f32 to vector<16x1xf32>
    %67 = arith.divf %65, %66 : vector<16x1xf32>
    %68 = vector.broadcast %67 : vector<16x1xf32> to vector<16x32xf32>
    %69 = arith.subf %61, %68 : vector<16x32xf32>
    %70 = arith.mulf %69, %69 : vector<16x32xf32>
    %cst_34 = arith.constant dense<0.000000e+00> : vector<16xf32>
    %71 = vector.multi_reduction <add>, %70, %cst_34 [1] : vector<16x32xf32> to vector<16xf32>
    %72 = vector.shape_cast %71 : vector<16xf32> to vector<16x1xf32>
    %cst_35 = arith.constant 3.200000e+01 : f32
    %73 = vector.broadcast %cst_35 : f32 to vector<16x1xf32>
    %74 = arith.divf %72, %73 : vector<16x1xf32>
    %75 = vector.broadcast %67 : vector<16x1xf32> to vector<16x32xf32>
    %76 = arith.subf %61, %75 : vector<16x32xf32>
    %cst_36 = arith.constant 9.99999997E-7 : f32
    %77 = vector.broadcast %cst_36 : f32 to vector<16x1xf32>
    %78 = arith.addf %74, %77 : vector<16x1xf32>
    %79 = math.rsqrt %78 : vector<16x1xf32>
    %80 = vector.broadcast %79 : vector<16x1xf32> to vector<16x32xf32>
    %81 = arith.mulf %76, %80 : vector<16x32xf32>
    %82 = vector.broadcast %62 : vector<1x32xf32> to vector<16x32xf32>
    %83 = arith.mulf %81, %82 : vector<16x32xf32>
    %84 = vector.broadcast %63 : vector<1x32xf32> to vector<16x32xf32>
    %85 = arith.addf %83, %84 : vector<16x32xf32>
    %c0_37 = arith.constant 0 : index
    %c0_38 = arith.constant 0 : index
    %86 = vector.load %arg10[%c0_37, %c0_38] : memref<32x32xf32, #tpu.memory_space<vmem>>, vector<32x32xf32>
    %cst_39 = arith.constant dense<0.000000e+00> : vector<16x32xf32>
    %87 = tpu.matmul %85, %86, %cst_39 {dimension_numbers = #tpu.dot_dimension_numbers<[1], [0], [0], [1], [0, 0, 1, 1], [], []>} : vector<16x32xf32>, vector<32x32xf32>, vector<16x32xf32> -> vector<16x32xf32>
    %c0_40 = arith.constant 0 : index
    %c0_41 = arith.constant 0 : index
    %88 = vector.load %arg11[%c0_40, %c0_41] : memref<1x32xf32, #tpu.memory_space<vmem>>, vector<1x32xf32>
    %89 = vector.broadcast %88 : vector<1x32xf32> to vector<16x32xf32>
    %90 = arith.addf %87, %89 : vector<16x32xf32>
    %91 = arith.addf %90, %85 : vector<16x32xf32>
    %cst_42 = arith.constant 0.000000e+00 : f32
    %92 = vector.broadcast %cst_42 : f32 to vector<16x32xf32>
    %93 = arith.maximumf %91, %92 : vector<16x32xf32>
    %c0_43 = arith.constant 0 : index
    %c0_44 = arith.constant 0 : index
    %94 = vector.load %arg12[%c0_43, %c0_44] : memref<1x32xf32, #tpu.memory_space<vmem>>, vector<1x32xf32>
    %c0_45 = arith.constant 0 : index
    %c0_46 = arith.constant 0 : index
    %95 = vector.load %arg13[%c0_45, %c0_46] : memref<1x32xf32, #tpu.memory_space<vmem>>, vector<1x32xf32>
    %cst_47 = arith.constant dense<0.000000e+00> : vector<16xf32>
    %96 = vector.multi_reduction <add>, %93, %cst_47 [1] : vector<16x32xf32> to vector<16xf32>
    %97 = vector.shape_cast %96 : vector<16xf32> to vector<16x1xf32>
    %cst_48 = arith.constant 3.200000e+01 : f32
    %98 = vector.broadcast %cst_48 : f32 to vector<16x1xf32>
    %99 = arith.divf %97, %98 : vector<16x1xf32>
    %100 = vector.broadcast %99 : vector<16x1xf32> to vector<16x32xf32>
    %101 = arith.subf %93, %100 : vector<16x32xf32>
    %102 = arith.mulf %101, %101 : vector<16x32xf32>
    %cst_49 = arith.constant dense<0.000000e+00> : vector<16xf32>
    %103 = vector.multi_reduction <add>, %102, %cst_49 [1] : vector<16x32xf32> to vector<16xf32>
    %104 = vector.shape_cast %103 : vector<16xf32> to vector<16x1xf32>
    %cst_50 = arith.constant 3.200000e+01 : f32
    %105 = vector.broadcast %cst_50 : f32 to vector<16x1xf32>
    %106 = arith.divf %104, %105 : vector<16x1xf32>
    %107 = vector.broadcast %99 : vector<16x1xf32> to vector<16x32xf32>
    %108 = arith.subf %93, %107 : vector<16x32xf32>
    %cst_51 = arith.constant 9.99999997E-7 : f32
    %109 = vector.broadcast %cst_51 : f32 to vector<16x1xf32>
    %110 = arith.addf %106, %109 : vector<16x1xf32>
    %111 = math.rsqrt %110 : vector<16x1xf32>
    %112 = vector.broadcast %111 : vector<16x1xf32> to vector<16x32xf32>
    %113 = arith.mulf %108, %112 : vector<16x32xf32>
    %114 = vector.broadcast %94 : vector<1x32xf32> to vector<16x32xf32>
    %115 = arith.mulf %113, %114 : vector<16x32xf32>
    %116 = vector.broadcast %95 : vector<1x32xf32> to vector<16x32xf32>
    %117 = arith.addf %115, %116 : vector<16x32xf32>
    %c0_52 = arith.constant 0 : index
    %c0_53 = arith.constant 0 : index
    %118 = vector.load %arg14[%c0_52, %c0_53] : memref<16x32xf32, #tpu.memory_space<vmem>>, vector<16x32xf32>
    tpu.vector_store %arg14[%c0_52, %c0_53], %117 {strides = array<i32>} : memref<16x32xf32, #tpu.memory_space<vmem>>, vector<16x32xf32>,
    return
  }
}

</mosaic_0001>

<bundles_post_ra>
// kernel: cross_attention_forward.1
= control target key start
LH: loop header
LB: loop body
LE: loop exit
PB: predicated region body
PF: predicated region fallthrough
CT: control target
= control target key end

     0   :  { %v1856_v7 = vmov 0.0   ;;  %v1857_v8 = vmov 0.0|0.0   ;;  %vm1858_vm0 = vmmov 0   ;;  %s2235_s0 = inlined_call_operand.vmem [shape: f32[16,32], index: 0, kind: input, shape index: {}]   ;;  %s2236_s1 = inlined_call_operand.vmem [shape: f32[48,32], index: 1, kind: input, shape index: {}]   ;;  %s2237_s2 = inlined_call_operand.vmem [shape: f32[32,48], index: 2, kind: input, shape index: {}]   ;;  %s2238_s3 = inlined_call_operand.vmem [shape: f32[32,192], index: 3, kind: input, shape index: {}]   ;;  %s2239_s4 = inlined_call_operand.vmem [shape: f32[4,48], index: 4, kind: input, shape index: {}]   ;;  %s2240_s5 = inlined_call_operand.vmem [shape: f32[48,128], index: 5, kind: input, shape index: {}]   ;;  %s2241_s6 = inlined_call_operand.vmem [shape: f32[1,32], index: 6, kind: input, shape index: {}]   ;;  %s2242_s7 = inlined_call_operand.vmem [shape: f32[64,32], index: 7, kind: input, shape index: {}]   ;;  %s2243_s8 = inlined_call_operand.vmem [shape: f32[1,32], index: 8, kind: input, shape index: {}]   ;;  %s2244_s9 = inlined_call_operand.vmem [shape: f32[1,32], index: 9, kind: input, shape index: {}]   ;;  %s2245_s10 = inlined_call_operand.vmem [shape: f32[32,32], index: 10, kind: input, shape index: {}]   ;;  %s2246_s11 = inlined_call_operand.vmem [shape: f32[1,32], index: 11, kind: input, shape index: {}]   ;;  %s2247_s12 = inlined_call_operand.vmem [shape: f32[1,32], index: 12, kind: input, shape index: {}]   ;;  %s2248_s13 = inlined_call_operand.vmem [shape: f32[1,32], index: 13, kind: input, shape index: {}]   ;;  %s2249_s14 = inlined_call_operand.hbm [shape: f32[16,32], index: 14, kind: output, shape index: {}]  }
   0x1   :  { %v61_v0 = vld [vmem:[%s2238_s3 + $0x8] sm:$0xff]  ;;  %v63_v1 = vld [vmem:[%s2238_s3 + $0x18] sm:$0xff]  ;;  %v60_v2 = vld [vmem:[%s2238_s3] sm:$0xff]  ;;  %139 = vmatprep.mubr.f32.mxu0 %v1856_v7  ;;  %1636 = vmatprep.subr.bf16.mxu1 %v1857_v8 }
   0x2   :  { %v1628_v3 = vpack.c.bf16 %v63_v1, %v61_v0  ;;  %v62_v4 = vld [vmem:[%s2238_s3 + $0x10] sm:$0xff]  ;;  %v65_v5 = vld [vmem:[%s2238_s3 + $0x28] sm:$0xff]  ;;  %v67_v6 = vld [vmem:[%s2238_s3 + $0x38] sm:$0xff]  ;;  %1492 = vmatprep.mubr.msk.f32.mxu1 %vm1858_vm0, %v1856_v7 }
   0x3   :  { %v1630_v9 = vpack.c.bf16 %v62_v4, %v60_v2  ;;  %v1632_v10 = vpack.c.bf16 %v67_v6, %v65_v5  ;;  %v64_v11 = vld [vmem:[%s2238_s3 + $0x20] sm:$0xff]  ;;  %v66_v12 = vld [vmem:[%s2238_s3 + $0x30] sm:$0xff]  ;;  %v51_v14 = vld [vmem:[%s2236_s1 + $0x8] sm:$0xff] }
   0x4   :  { %1629 = vmatprep.subr.bf16.mxu0 %v1628_v3  ;;  %v50_v13 = vld [vmem:[%s2236_s1] sm:$0xff]  ;;  %v1634_v15 = vpack.c.bf16 %v66_v12, %v64_v11  ;;  %v52_v17 = vld [vmem:[%s2236_s1 + $0x10] sm:$0xff]  ;;  %v53_v18 = vld [vmem:[%s2236_s1 + $0x18] sm:$0xff] }
   0x5   :  { %1631 = vmatpush1.bf16.msra.mxu0 %v1630_v9  ;;  %v1972_v16 = vpack.c.bf16 %v51_v14, %v50_v13 }
   0x6   :  { %1633 = vmatprep.subr.bf16.mxu0 %v1632_v10 }
   0x7   :  { %19 = vsyncpa [#allocation3], 0  ;;  %1638 = vmatpush3.bf16.msra.mxu1 %v1972_v16  ;;  %v1981_v19 = vpack.c.bf16 %v53_v18, %v52_v17  ;;  %v54_v20 = vld [vmem:[%s2236_s1 + $0x20] sm:$0xff]  ;;  %v55_v21 = vld [vmem:[%s2236_s1 + $0x28] sm:$0xff]  ;;  %vm68_vm1 = vcmask 261120   ;;  %vm153_vm2 = vcmask 392192   ;;  %v330_v61 = vlaneseq }
   0x8   :  { %1639 = vmatprep.subr.bf16.mxu1 %v1857_v8  ;;  %v1992_v22 = vld [vmem:[%s2235_s0] sm:$0xff]  ;;  %v1995_v23 = vpack.c.bf16 %v55_v21, %v54_v20  ;;  %v2002_v24 = vld [vmem:[%s2235_s0 + $0x8] sm:$0xff]  ;;  %v229_v28 = vld [vmem:[%s2240_s5 + $0x10] sm:$0xff]  ;;  %s1859_s28 = smov 80   ;;  %s1860_s0 = smov 112  }
   0x9   :  { %1635 = vmatpush1.bf16.msra.mxu0 %v1634_v15  ;;  %v152_v25 = vld [vmem:[%s2239_s4] sm:$0xf]  ;;  %v228_v27 = vld [vmem:[%s2240_s5 + $0x8] sm:$0xff]  ;;  %v230_v30 = vld [vmem:[%s2240_s5 + $0x18] sm:$0xff]  ;;  %v331_v0 = vshrl.u32 %v330_v61, 7  ;;  %s1863_s26 = smov 64  }
   0xa   :  { %v227_v26 = vld [vmem:[%s2240_s5] sm:$0xff]  ;;  %v1649_v31 = vpack.c.bf16 %v230_v30, %v229_v28  ;;  %v232_v33 = vld [vmem:[%s2240_s5 + $0x28] sm:$0xff]  ;;  %v58_v37 = vld [vmem:[%s2237_s2 + $0x10] sm:$0xff]  ;;  %s1864_s21 = smov [#allocation2]  }
   0xb   :  { %1641 = vmatpush3.bf16.msra.mxu1 %v1981_v19  ;;  %v1645_v29 = vpack.c.bf16 %v228_v27, %v227_v26  ;;  %v231_v32 = vld [vmem:[%s2240_s5 + $0x20] sm:$0xff]  ;;  %v57_v36 = vld [vmem:[%s2237_s2 + $0x8] sm:$0xff]  ;;  %v59_v38 = vld [vmem:[%s2237_s2 + $0x18] sm:$0xff]  ;;  %v332_v1 = vsub.s32 0, %v331_v0  ;;  %v504_v13 = vsub.s32 2, %v331_v0  ;;  %v599_v14 = vsub.s32 3, %v331_v0 }
   0xc   :  { %1370 = vmatmul.mubr.msk.f32.vlgmr.msra.gmra.mrb[0].mxu0 %vm68_vm1, %v1992_v22  ;;  %1642 = vmatprep.subr.bf16.mxu1 %v1857_v8  ;;  %v56_v34 = vld [vmem:[%s2237_s2] sm:$0xff]  ;;  %v1653_v35 = vpack.c.bf16 %v232_v33, %v231_v32  ;;  %s1861_s2 = smov 32   ;;  %v690_v27 = vld [vmem:[%s2242_s7 + $0x30] sm:$0xff]  ;;  %s1359_s22 = sshll.u32 %s1864_s21, 4  ;;  %s1360_s22 = int_to_ptr.vmem [resolvable:$true] %s1359_s22 }
   0xd   :  { %145 = vmatprep.mubr.f32.mxu0 %v1856_v7  ;;  %1646 = vmatprep.subr.bf16.mxu0 %v1645_v29  ;;  %v417_v7 = vsub.s32 1, %v331_v0  ;;  %s1832_s23 = scalar_lea.vmem %s1360_s22, 256  ;;  %p1837_p1 = scmp.lt.s32.totalorder %s1360_s22, %s1360_s22 }
   0xe   :  { %1648 = vmatpush3.bf16.msra.mxu0 %v1645_v29  ;;  %v686_v29 = vld [vmem:[%s2242_s7 + $0x10] sm:$0xff]  ;;  %p1833_p0 = scmp.ne.s32.totalorder %s1360_s22, %s1832_s23  ;;  %p1838_p2 = scmp.lt.s32.totalorder %s1832_s23, %s1832_s23 }
   0xf   :  { %1644 = vmatpush3.bf16.msra.mxu1 %v1995_v23  ;;  %1650 = vmatprep.subr.bf16.mxu0 %v1649_v31 }
  0x10   :  { %1371 = vmatmul.mubr.msk.f32.gmra.mrb[2].mxu0 %vm68_vm1, %v2002_v24  ;;  %1658 = vmatprep.subr.bf16.mxu1 %v1972_v16  ;;  %p1839_p3 = por %p1838_p2, %p1837_p1 }
  0x11   :  { %1507 = vmatprep.mubr.msk.f32.mxu0 %vm153_vm2, %v56_v34 }
  0x12   :  { %1493 = vmatmul.mubr.msk.f32.vlgmr.msra.gmra.mrb[0].mxu1 %vm153_vm2, %v152_v25  ;;  %1652 = vmatpush3.bf16.msra.mxu0 %v1649_v31  ;;  %v684_v31 = vld [vmem:[%s2242_s7] sm:$0xff]  ;;  %p1840_p4 = pnand %p1839_p3, %p1833_p0 }
  0x13   :  { %1660 = vmatpush3.bf16.msra.mxu1 %v1972_v16  ;;  %1654 = vmatprep.subr.bf16.mxu0 %v1653_v35 }
  0x14   :  { %1662 = vmatprep.subr.bf16.mxu1 %v1981_v19 }
  0x16   :  { %1656 = vmatpush3.bf16.msra.mxu0 %v1653_v35 }
  0x17   :  { %1664 = vmatpush3.bf16.msra.mxu1 %v1981_v19  ;;  %1670 = vmatprep.subr.bf16.mxu0 %v1972_v16 }
  0x18   :  { %1666 = vmatprep.subr.bf16.mxu1 %v1995_v23 }
  0x19   :  { %1508 = vmatmul.mubr.msk.f32.vlgmr.msra.gmra.mrb[4].mxu0 %vm153_vm2, %v57_v36 }
  0x1a   :  { %1672 = vmatpush3.bf16.msra.mxu0 %v1972_v16  ;;  %1510 = vmatprep.mubr.msk.f32.mxu0 %vm153_vm2, %v58_v37  ;;  %v687_v37 = vld [vmem:[%s2242_s7 + $0x18] sm:$0xff] }
  0x1b   :  { %1668 = vmatpush3.bf16.msra.mxu1 %v1995_v23  ;;  %1674 = vmatprep.subr.bf16.mxu0 %v1981_v19 }
  0x1c   :  { %1682 = vmatprep.subr.bf16.mxu1 %v1972_v16 }
  0x1d   :  { %1511 = vmatmul.mubr.msk.f32.gmra.mrb[6].mxu0 %vm153_vm2, %v59_v38  ;;  %v685_v38 = vld [vmem:[%s2242_s7 + $0x8] sm:$0xff] }
  0x1e   :  { %1676 = vmatpush3.bf16.msra.mxu0 %v1981_v19 }
  0x1f   :  { %1678 = vmatprep.subr.bf16.mxu0 %v1995_v23 }
  0x22   :  { %1680 = vmatpush3.bf16.msra.mxu0 %v1995_v23 }
  0x23   :  { %1694 = vmatprep.subr.bf16.mxu0 %v1972_v16 }
  0xdf   :  { %v141_v39 = vpop.f32.mrb[0].mxu0 }
  0xe0   :  { %419 = vrot.lane.b32.xlu0 %v141_v39, %s1859_s28  ;;  %v143_v40 = vpop.f32.mrb[1].mxu0  ;;  %1525 = vmatprep.mubr.msk.f32.mxu1 %vm153_vm2, %v141_v39 }
  0xe1   :  { %601 = vrot.lane.b32.xlu1 %v143_v40, %s1860_s0 }
  0xe3   :  { %v147_v41 = vpop.f32.mrb[2].mxu0 }
  0xe4   :  { %421 = vrot.lane.b32.xlu0 %v147_v41, %s1859_s28  ;;  %v149_v42 = vpop.f32.mrb[3].mxu0  ;;  %1526 = vmatmul.mubr.msk.f32.vlgmr.msra.gmra.mrb[2].mxu1 %vm153_vm2, %v147_v41 }
  0xe5   :  { %603 = vrot.lane.b32.xlu1 %v149_v42, %s1860_s0  ;;  %1684 = vmatpush3.bf16.msra.mxu1 %v1972_v16  ;;  %v223_v43 = vpop.f32.mrb[0].mxu1 }
  0xe6   :  { %1686 = vmatprep.subr.bf16.mxu1 %v1981_v19  ;;  %v1494_v44 = vpop.f32.mrb[1].mxu1  ;;  %v333_v2 = vrot.slane %v223_v43, %v332_v1  ;;  %v418_v8 = vrot.slane %v223_v43, %v417_v7  ;;  %v505_v15 = vrot.slane %v223_v43, %v504_v13 }
  0xe8   :  { %508 = vrot.lane.b32.xlu0 %v141_v39, %s1861_s2 }
  0xe9   :  { %510 = vrot.lane.b32.xlu1 %v143_v40, %s1861_s2  ;;  %1688 = vmatpush3.bf16.msra.mxu1 %v1981_v19 }
  0xea   :  { %1690 = vmatprep.subr.bf16.mxu1 %v1995_v23 }
  0xec   :  { %512 = vrot.lane.b32.xlu0 %v147_v41, %s1861_s2  ;;  %v1509_v45 = vpop.f32.mrb[4].mxu0 }
  0xed   :  { %514 = vrot.lane.b32.xlu1 %v149_v42, %s1861_s2  ;;  %1692 = vmatpush3.bf16.msra.mxu1 %v1995_v23  ;;  %v311_v46 = vpop.f32.mrb[5].mxu0 }
  0xee   :  { %v2083_v59 = vpack.i.bf16 %v1509_v45, %v311_v46  ;;  %v2085_v60 = vpack.c.bf16 %v1509_v45, %v311_v46 }
  0xf0   :  { %v1512_v49 = vpop.f32.mrb[6].mxu0 }
  0xf1   :  { %v321_v50 = vpop.f32.mrb[7].mxu0 }
  0xf2   :  { %v2087_v62 = vpack.i.bf16 %v1512_v49, %v321_v50  ;;  %v2089_v63 = vpack.c.bf16 %v1512_v49, %v321_v50 }
 0x152   :  { %v420_v47 = vpop.permute.xlu0 %419 }
 0x153   :  { %1540 = vmatprep.mubr.msk.f32.mxu0 %vm153_vm2, %v420_v47  ;;  %v602_v48 = vpop.permute.xlu1 %601  ;;  %v689_v47 = vld [vmem:[%s2242_s7 + $0x28] sm:$0xff] }
 0x156   :  { %v422_v51 = vpop.permute.xlu0 %421 }
 0x157   :  { %1541 = vmatmul.mubr.msk.f32.vlgmr.msra.gmra.mrb[8].mxu0 %vm153_vm2, %v422_v51  ;;  %v604_v52 = vpop.permute.xlu1 %603 }
 0x158   :  { %1696 = vmatpush3.bf16.msra.mxu0 %v1972_v16  ;;  %1570 = vmatprep.mubr.msk.f32.mxu0 %vm153_vm2, %v602_v48 }
 0x159   :  { %1698 = vmatprep.subr.bf16.mxu0 %v1981_v19 }
 0x15a   :  { %v509_v53 = vpop.permute.xlu0 %508 }
 0x15b   :  { %v511_v54 = vpop.permute.xlu1 %510 }
 0x15c   :  { %1700 = vmatpush3.bf16.msra.mxu0 %v1981_v19  ;;  %v516_v55 = vsel %vm68_vm1, %v509_v53, %v511_v54  ;;  %v600_v19 = vrot.slane %v223_v43, %v599_v14  ;;  %v688_v43 = vld [vmem:[%s2242_s7 + $0x20] sm:$0xff] }
 0x15d   :  { %1555 = vmatprep.mubr.msk.f32.mxu1 %vm153_vm2, %v516_v55  ;;  %1702 = vmatprep.subr.bf16.mxu0 %v1995_v23 }
 0x15e   :  { %v513_v56 = vpop.permute.xlu0 %512 }
 0x15f   :  { %v515_v57 = vpop.permute.xlu1 %514 }
 0x160   :  { %1704 = vmatpush3.bf16.msra.mxu0 %v1995_v23  ;;  %v517_v58 = vsel %vm68_vm1, %v513_v56, %v515_v57  ;;  %v691_v23 = vld [vmem:[%s2242_s7 + $0x38] sm:$0xff]  ;;  %s1862_s7 = smov 96  }
 0x161   :  { %1556 = vmatmul.mubr.msk.f32.vlgmr.msra.gmra.mrb[4].mxu1 %vm153_vm2, %v517_v58 }
 0x163   :  { %1571 = vmatmul.mubr.msk.f32.vlgmr.msra.gmra.mrb[10].mxu0 %vm153_vm2, %v604_v52 }
 0x1b7   :  { %v1527_v3 = vpop.f32.mrb[2].mxu1 }
 0x1b8   :  { %v412_v4 = vadd.f32 %v1527_v3, %v333_v2  ;;  %v406_v5 = vpop.f32.mrb[3].mxu1 }
 0x1b9   :  { %v407_v6 = vadd.f32 %v406_v5, %v333_v2 }
 0x1ba   :  { %v693_v42 = vadd.f32 %v685_v38, %v412_v4 }
 0x1bb   :  { %v692_v36 = vadd.f32 %v684_v31, %v407_v6 }
 0x1bc   :  { %v703_v45 = vsel %vm68_vm1, %v693_v42, -inf }
 0x1bd   :  { %v700_v41 = vsel %vm68_vm1, %v692_v36, -inf }
 0x22a   :  { %v1542_v9 = vpop.f32.mrb[8].mxu0 }
 0x22b   :  { %v499_v10 = vadd.f32 %v1542_v9, %v418_v8  ;;  %v493_v11 = vpop.f32.mrb[9].mxu0 }
 0x22c   :  { %v494_v12 = vadd.f32 %v493_v11, %v418_v8 }
 0x22d   :  { %v695_v40 = vadd.f32 %v687_v37, %v499_v10 }
 0x22e   :  { %v694_v34 = vadd.f32 %v686_v29, %v494_v12 }
 0x22f   :  { %v709_v44 = vsel %vm68_vm1, %v695_v40, -inf }
 0x230   :  { %v706_v39 = vsel %vm68_vm1, %v694_v34, -inf }
 0x234   :  { %v1557_v16 = vpop.f32.mrb[4].mxu1 }
 0x235   :  { %v594_v17 = vadd.f32 %v1557_v16, %v505_v15  ;;  %v588_v18 = vpop.f32.mrb[5].mxu1 }
 0x236   :  { %v589_v20 = vadd.f32 %v588_v18, %v505_v15  ;;  %v1572_v21 = vpop.f32.mrb[10].mxu0 }
 0x237   :  { %v681_v25 = vadd.f32 %v1572_v21, %v600_v19  ;;  %v675_v26 = vpop.f32.mrb[11].mxu0  ;;  %v697_v49 = vadd.f32 %v689_v47, %v594_v17 }
 0x238   :  { %v676_v28 = vadd.f32 %v675_v26, %v600_v19  ;;  %v696_v46 = vadd.f32 %v688_v43, %v589_v20 }
 0x239   :  { %v2100_v30 = vadd.f32 %v691_v23, %v681_v25  ;;  %v715_v50 = vsel %vm68_vm1, %v697_v49, -inf }
 0x23a   :  { %v2105_v32 = vadd.f32 %v690_v27, %v676_v28  ;;  %v712_v48 = vsel %vm68_vm1, %v696_v46, -inf }
 0x23b   :  { %v721_v33 = vsel %vm68_vm1, %v2100_v30, -inf }
 0x23c   :  { %722 = vmax.xlane.f32.xlu1 %v721_v33  ;;  %v718_v35 = vsel %vm68_vm1, %v2105_v32, -inf }
 0x23d   :  { %719 = vmax.xlane.f32.xlu0 %v718_v35 }
 0x240   :  { %707 = vmax.xlane.f32.xlu1 %v706_v39 }
 0x241   :  { %701 = vmax.xlane.f32.xlu0 %v700_v41 }
 0x244   :  { %710 = vmax.xlane.f32.xlu1 %v709_v44 }
 0x245   :  { %704 = vmax.xlane.f32.xlu0 %v703_v45 }
 0x249   :  { %713 = vmax.xlane.f32.xlu0 %v712_v48 }
 0x24d   :  { %716 = vmax.xlane.f32.xlu0 %v715_v50 }
 0x255   :  { %1763 = vrot.lane.b32.xlu1 %v2083_v59, %s1861_s2 }
 0x2c9   :  { %v723_v51 = vpop.xlane.xlu1 %722 }
 0x2ca   :  { %v720_v52 = vpop.xlane.xlu0 %719  ;;  %v731_v14 = vsub.f32 %v2100_v30, %v723_v51 }
 0x2cc   :  { %v746_v20 = vmul.f32 1.442695, %v731_v14 }
 0x2cd   :  { %v708_v53 = vpop.xlane.xlu1 %707 }
 0x2ce   :  { %v702_v54 = vpop.xlane.xlu0 %701  ;;  %v726_v56 = vsub.f32 %v694_v34, %v708_v53  ;;  %v730_v34 = vsub.f32 %v2105_v32, %v720_v52 }
 0x2cf   :  { %v724_v55 = vsub.f32 %v692_v36, %v702_v54 }
 0x2d0   :  { %v736_v3 = vmul.f32 1.442695, %v726_v56  ;;  %v744_v35 = vmul.f32 1.442695, %v730_v34 }
 0x2d1   :  { %v732_v57 = vmul.f32 1.442695, %v724_v55  ;;  %v711_v58 = vpop.xlane.xlu1 %710 }
 0x2d2   :  { %v727_v61 = vsub.f32 %v695_v40, %v711_v58  ;;  %v705_v0 = vpop.xlane.xlu0 %704 }
 0x2d3   :  { %1792 = vpow2.f32 %v732_v57  ;;  %v725_v1 = vsub.f32 %v693_v42, %v705_v0 }
 0x2d4   :  { %v738_v2 = vmul.f32 1.442695, %v727_v61 }
 0x2d5   :  { %v734_v4 = vmul.f32 1.442695, %v725_v1  ;;  %v1764_v5 = vpop.permute.xlu1 %1763 }
 0x2d6   :  { %1794 = vpow2.f32 %v738_v2  ;;  %v1766_v6 = vunpack.i.h.bf16 %v1764_v5  ;;  %v1765_v7 = vunpack.i.l.bf16 %v1764_v5  ;;  %v714_v8 = vpop.xlane.xlu0 %713 }
 0x2d7   :  { %1796 = vpow2.f32 %v734_v4  ;;  %v728_v10 = vsub.f32 %v696_v46, %v714_v8 }
 0x2d8   :  { %v1713_v9 = vpack.c.bf16 %v1766_v6, %v1765_v7  ;;  %1798 = vpow2.f32 %v736_v3 }
 0x2d9   :  { %v740_v15 = vmul.f32 1.442695, %v728_v10 }
 0x2da   :  { %v717_v11 = vpop.xlane.xlu0 %716  ;;  %1714 = vmatprep.subr.bf16.mxu1 %v1713_v9 }
 0x2db   :  { %v729_v12 = vsub.f32 %v697_v49, %v717_v11  ;;  %1716 = vmatpush3.bf16.msra.mxu1 %v1713_v9 }
 0x2dd   :  { %v2131_v13 = vpop.eup %1792  ;;  %v742_v16 = vmul.f32 1.442695, %v729_v12 }
 0x2de   :  { %v748_v17 = vsel %vm68_vm1, %v2131_v13, 0.0 }
 0x2df   :  { %1800 = vpow2.f32 %v742_v16  ;;  %749 = vadd.xlane.f32.xlu1 %v748_v17 }
 0x2e0   :  { %v2136_v18 = vpop.eup %1794  ;;  %1802 = vpow2.f32 %v740_v15 }
 0x2e1   :  { %v2138_v19 = vpop.eup %1796  ;;  %v757_v21 = vsel %vm68_vm1, %v2136_v18, 0.0  ;;  %1804 = vpow2.f32 %v746_v20 }
 0x2e2   :  { %v751_v23 = vsel %vm68_vm1, %v2138_v19, 0.0  ;;  %v1799_v25 = vpop.eup %1798  ;;  %1806 = vpow2.f32 %v744_v35 }
 0x2e3   :  { %752 = vadd.xlane.f32.xlu0 %v751_v23  ;;  %758 = vadd.xlane.f32.xlu1 %v757_v21  ;;  %v754_v26 = vsel %vm68_vm1, %v1799_v25, 0.0 }
 0x2e7   :  { %755 = vadd.xlane.f32.xlu1 %v754_v26 }
 0x2e9   :  { %v2145_v27 = vpop.eup %1800 }
 0x2ea   :  { %v763_v28 = vsel %vm68_vm1, %v2145_v27, 0.0  ;;  %v2149_v29 = vpop.eup %1802 }
 0x2eb   :  { %764 = vadd.xlane.f32.xlu0 %v763_v28  ;;  %v760_v30 = vsel %vm68_vm1, %v2149_v29, 0.0  ;;  %v1805_v31 = vpop.eup %1804 }
 0x2ec   :  { %v769_v33 = vsel %vm68_vm1, %v1805_v31, 0.0  ;;  %v1807_v36 = vpop.eup %1806 }
 0x2ed   :  { %v766_v37 = vsel %vm68_vm1, %v1807_v36, 0.0 }
 0x2ef   :  { %761 = vadd.xlane.f32.xlu0 %v760_v30 }
 0x2f3   :  { %770 = vadd.xlane.f32.xlu0 %v769_v33 }
 0x2f8   :  { %1773 = vrot.lane.b32.xlu1 %v2083_v59, %s1862_s7 }
 0x309   :  { %1768 = vrot.lane.b32.xlu0 %v2087_v62, %s1861_s2 }
 0x30d   :  { %1783 = vrot.lane.b32.xlu0 %v2087_v62, %s1862_s7 }
 0x31c   :  { %767 = vadd.xlane.f32.xlu1 %v766_v37 }
 0x32d   :  { %1778 = vrot.lane.b32.xlu1 %v2083_v59, %s1863_s26 }
 0x331   :  { %1788 = vrot.lane.b32.xlu1 %v2087_v62, %s1863_s26 }
 0x36c   :  { %v750_v38 = vpop.xlane.xlu1 %749 }
 0x370   :  { %v759_v39 = vpop.xlane.xlu1 %758  ;;  %v753_v40 = vpop.xlane.xlu0 %752 }
 0x374   :  { %v756_v32 = vpop.xlane.xlu1 %755 }
 0x375   :  { %1808 = vrcp.f32 %v756_v32 }
 0x376   :  { %1810 = vrcp.f32 %v759_v39 }
 0x377   :  { %1812 = vrcp.f32 %v750_v38 }
 0x378   :  { %v765_v41 = vpop.xlane.xlu0 %764  ;;  %v1774_v42 = vpop.permute.xlu1 %1773 }
 0x379   :  { %v1776_v43 = vunpack.i.h.bf16 %v1774_v42  ;;  %v1775_v44 = vunpack.i.l.bf16 %v1774_v42  ;;  %v1212_v42 = vld [vmem:[%s2245_s10] sm:$0xff] }
 0x37b   :  { %v1705_v45 = vpack.c.bf16 %v1776_v43, %v1775_v44  ;;  %v1213_v43 = vld [vmem:[%s2245_s10 + $0x8] sm:$0xff] }
 0x37c   :  { %v762_v46 = vpop.xlane.xlu0 %761  ;;  %v1737_v44 = vpack.c.bf16 %v1213_v43, %v1212_v42 }
 0x37d   :  { %1706 = vmatprep.subr.bf16.mxu0 %v1705_v45 }
 0x37e   :  { %1708 = vmatpush3.bf16.msra.mxu0 %v1705_v45  ;;  %v1214_v45 = vld [vmem:[%s2245_s10 + $0x10] sm:$0xff] }
 0x37f   :  { %v1809_v47 = vpop.eup %1808 }
 0x380   :  { %v771_v48 = vpop.xlane.xlu0 %770  ;;  %v777_v49 = vmul.f32 %v1809_v47, %v1799_v25  ;;  %v1811_v56 = vpop.eup %1810 }
 0x381   :  { %v779_v57 = vmul.f32 %v1811_v56, %v2136_v18  ;;  %1814 = vrcp.f32 %v771_v48  ;;  %v1813_v61 = vpop.eup %1812 }
 0x382   :  { %1581 = vmatprep.mubr.msk.f32.mxu0 %vm68_vm1, %v777_v49  ;;  %v773_v5 = vmul.f32 %v1813_v61, %v2131_v13 }
 0x384   :  { %v1769_v59 = vpop.permute.xlu0 %1768 }
 0x385   :  { %v1771_v62 = vunpack.i.h.bf16 %v1769_v59  ;;  %v1770_v50 = vunpack.i.l.bf16 %v1769_v59 }
 0x387   :  { %v1717_v51 = vpack.c.bf16 %v1771_v62, %v1770_v50 }
 0x388   :  { %v1784_v52 = vpop.permute.xlu0 %1783 }
 0x389   :  { %v1786_v53 = vunpack.i.h.bf16 %v1784_v52  ;;  %v1785_v54 = vunpack.i.l.bf16 %v1784_v52  ;;  %1718 = vmatprep.subr.bf16.mxu1 %v1717_v51 }
 0x38a   :  { %1720 = vmatpush3.bf16.msra.mxu1 %v1717_v51 }
 0x38b   :  { %v1709_v55 = vpack.c.bf16 %v1786_v53, %v1785_v54  ;;  %1722 = vmatprep.subr.bf16.mxu1 %v2085_v60  ;;  %v1815_v0 = vpop.eup %1814  ;;  %v1394_v53 = vld [vmem:[%s2243_s8] ss:$0 sm:$0xff] }
 0x38c   :  { %v787_v4 = vmul.f32 %v1815_v0, %v1805_v31 }
 0x38d   :  { %1710 = vmatprep.subr.bf16.mxu0 %v1709_v55 }
 0x38e   :  { %1712 = vmatpush3.bf16.msra.mxu0 %v1709_v55  ;;  %v1395_v55 = vld [vmem:[%s2244_s9] ss:$0 sm:$0xff] }
 0x38f   :  { %1738 = vmatprep.subr.bf16.mxu0 %v1737_v44 }
 0x391   :  { %1582 = vmatmul.mubr.msk.f32.vlgmr.msra.gmra.mrb[12].mxu0 %vm68_vm1, %v779_v57 }
 0x392   :  { %1740 = vmatpush3.bf16.msra.mxu0 %v1737_v44 }
 0x3a9   :  { %v768_v58 = vpop.xlane.xlu1 %767 }
 0x3aa   :  { %1816 = vrcp.f32 %v768_v58 }
 0x3ab   :  { %1818 = vrcp.f32 %v753_v40 }
 0x3ac   :  { %1820 = vrcp.f32 %v762_v46  ;;  %v1215_v46 = vld [vmem:[%s2245_s10 + $0x18] sm:$0xff] }
 0x3ad   :  { %v1779_v1 = vpop.permute.xlu1 %1778  ;;  %1822 = vrcp.f32 %v765_v41  ;;  %v1741_v47 = vpack.c.bf16 %v1215_v46, %v1214_v45 }
 0x3ae   :  { %v1781_v6 = vunpack.i.h.bf16 %v1779_v1  ;;  %v1780_v7 = vunpack.i.l.bf16 %v1779_v1 }
 0x3af   :  { %1742 = vmatprep.subr.bf16.mxu0 %v1741_v47 }
 0x3b0   :  { %v1729_v11 = vpack.c.bf16 %v1781_v6, %v1780_v7  ;;  %1744 = vmatpush3.bf16.msra.mxu0 %v1741_v47 }
 0x3b1   :  { %v1789_v8 = vpop.permute.xlu1 %1788 }
 0x3b2   :  { %v1791_v12 = vunpack.i.h.bf16 %v1789_v8  ;;  %v1790_v14 = vunpack.i.l.bf16 %v1789_v8 }
 0x3b4   :  { %v1817_v2 = vpop.eup %1816  ;;  %v1733_v16 = vpack.c.bf16 %v1791_v12, %v1790_v14 }
 0x3b5   :  { %v785_v3 = vmul.f32 %v1817_v2, %v1807_v36  ;;  %v1819_v9 = vpop.eup %1818  ;;  %v1396_v2 = vld [vmem:[%s2246_s11] ss:$0 sm:$0xff] }
 0x3b6   :  { %v1821_v10 = vpop.eup %1820  ;;  %v775_v13 = vmul.f32 %v1819_v9, %v2138_v19  ;;  %v1389_v19 = vld [vmem:[%s2241_s6] ss:$0 sm:$0xff] }
 0x3b7   :  { %1592 = vmatprep.mubr.msk.f32.mxu1 %vm68_vm1, %v785_v3  ;;  %v781_v15 = vmul.f32 %v1821_v10, %v2149_v29  ;;  %v986_v20 = vadd.f32 %v1389_v19, %v2002_v24  ;;  %v985_v23 = vadd.f32 %v1389_v19, %v1992_v22 }
 0x3b8   :  { %1593 = vmatmul.mubr.msk.f32.vlgmr.msra.gmra.mrb[6].mxu1 %vm68_vm1, %v787_v4 }
 0x3b9   :  { %1724 = vmatpush3.bf16.msra.mxu1 %v2085_v60  ;;  %1603 = vmatprep.mubr.msk.f32.mxu1 %vm68_vm1, %v773_v5  ;;  %v1823_v60 = vpop.eup %1822 }
 0x3ba   :  { %1726 = vmatprep.subr.bf16.mxu1 %v2089_v63  ;;  %v783_v17 = vmul.f32 %v1823_v60, %v2145_v27 }
 0x3bd   :  { %1728 = vmatpush3.bf16.msra.mxu1 %v2089_v63 }
 0x3be   :  { %1730 = vmatprep.subr.bf16.mxu1 %v1729_v11 }
 0x3c0   :  { %1604 = vmatmul.mubr.msk.f32.vlgmr.msra.gmra.mrb[6].mxu1 %vm68_vm1, %v775_v13 }
 0x3c1   :  { %1732 = vmatpush3.bf16.msra.mxu1 %v1729_v11  ;;  %1614 = vmatprep.mubr.msk.f32.mxu1 %vm68_vm1, %v781_v15 }
 0x3c2   :  { %1734 = vmatprep.subr.bf16.mxu1 %v1733_v16 }
 0x3c5   :  { %1736 = vmatpush3.bf16.msra.mxu1 %v1733_v16 }
 0x3c8   :  { %1615 = vmatmul.mubr.msk.f32.vlgmr.msra.gmra.mrb[6].mxu1 %vm68_vm1, %v783_v17 }
 0x464   :  { %v1583_v18 = vpop.f32.mrb[12].mxu0 }
 0x465   :  { %v876_v63 = vpop.f32.mrb[13].mxu0 }
 0x49b   :  { %v1616_v21 = vpop.f32.mrb[6].mxu1 }
 0x49c   :  { %v1745_v25 = vadd.f32 %v1616_v21, %v1583_v18  ;;  %v1152_v26 = vpop.f32.mrb[7].mxu1 }
 0x49d   :  { %v1746_v28 = vadd.f32 %v1152_v26, %v876_v63 }
 0x49e   :  { %v1164_v29 = vadd.f32 %v1745_v25, %v986_v20 }
 0x49f   :  { %v1163_v30 = vadd.f32 %v1746_v28, %v985_v23 }
 0x4a0   :  { %v1166_v31 = vmax.f32 %v1164_v29, 0.0 }
 0x4a1   :  { %v1165_v27 = vmax.f32 %v1163_v30, 0.0 }
 0x4a2   :  { %v1172_v33 = vsel %vm68_vm1, %v1166_v31, 0.0 }
 0x4a3   :  { %1173 = vadd.xlane.f32.xlu1 %v1172_v33  ;;  %v1169_v34 = vsel %vm68_vm1, %v1165_v27, 0.0 }
 0x4a4   :  { %1170 = vadd.xlane.f32.xlu0 %v1169_v34 }
 0x530   :  { %v1174_v35 = vpop.xlane.xlu1 %1173 }
 0x531   :  { %v1177_v36 = vmul.f32 0.03125, %v1174_v35  ;;  %v1171_v37 = vpop.xlane.xlu0 %1170  ;;  %v1400_v35 = vld [vmem:[%s2248_s13] ss:$0 sm:$0xff] }
 0x532   :  { %v1176_v24 = vmul.f32 0.03125, %v1171_v37 }
 0x533   :  { %v1179_v38 = vsub.f32 %v1166_v31, %v1177_v36  ;;  %v1399_v31 = vld [vmem:[%s2247_s12] ss:$0 sm:$0xff] }
 0x534   :  { %v1178_v39 = vsub.f32 %v1165_v27, %v1176_v24 }
 0x535   :  { %v1181_v32 = vmul.f32 %v1179_v38, %v1179_v38 }
 0x536   :  { %v1180_v22 = vmul.f32 %v1178_v39, %v1178_v39 }
 0x537   :  { %v1185_v41 = vsel %vm68_vm1, %v1181_v32, 0.0 }
 0x538   :  { %v1182_v40 = vsel %vm68_vm1, %v1180_v22, 0.0 }
 0x539   :  { %1183 = vadd.xlane.f32.xlu0 %v1182_v40 }
 0x53d   :  { %1186 = vadd.xlane.f32.xlu0 %v1185_v41 }
 0x5c6   :  { %v1184_v48 = vpop.xlane.xlu0 %1183 }
 0x5c7   :  { %v1188_v49 = vmul.f32 0.03125, %v1184_v48 }
 0x5c9   :  { %v1190_v59 = vadd.f32 1e-06, %v1188_v49 }
 0x5ca   :  { %v1187_v62 = vpop.xlane.xlu0 %1186 }
 0x5cb   :  { %1824 = vrsqrt.f32 %v1190_v59  ;;  %v1189_v50 = vmul.f32 0.03125, %v1187_v62 }
 0x5cd   :  { %v1191_v51 = vadd.f32 1e-06, %v1189_v50 }
 0x5cf   :  { %1826 = vrsqrt.f32 %v1191_v51 }
 0x5d5   :  { %v1825_v52 = vpop.eup %1824 }
 0x5d6   :  { %v1194_v54 = vmul.f32 %v1825_v52, %v1178_v39 }
 0x5d8   :  { %v1202_v56 = vmul.f32 %v1394_v53, %v1194_v54 }
 0x5d9   :  { %v1827_v57 = vpop.eup %1826 }
 0x5da   :  { %v1195_v58 = vmul.f32 %v1827_v57, %v1179_v38  ;;  %v1210_v61 = vadd.f32 %v1395_v55, %v1202_v56 }
 0x5dc   :  { %v1203_v0 = vmul.f32 %v1394_v53, %v1195_v58  ;;  %1625 = vmatprep.mubr.msk.f32.mxu0 %vm68_vm1, %v1210_v61 }
 0x5de   :  { %v1211_v1 = vadd.f32 %v1395_v55, %v1203_v0 }
 0x5e0   :  { %1626 = vmatmul.mubr.msk.f32.vlgmr.msra.gmra.mrb[14].mxu0 %vm68_vm1, %v1211_v1 }
 0x6b3   :  { %v1627_v3 = vpop.f32.mrb[14].mxu0 }
 0x6b4   :  { %v1301_v4 = vadd.f32 %v1627_v3, %v1396_v2  ;;  %v1295_v5 = vpop.f32.mrb[15].mxu0 }
 0x6b5   :  { %v1296_v6 = vadd.f32 %v1396_v2, %v1295_v5 }
 0x6b6   :  { %v1305_v7 = vadd.f32 %v1301_v4, %v1211_v1 }
 0x6b7   :  { %v1304_v8 = vadd.f32 %v1296_v6, %v1210_v61 }
 0x6b8   :  { %v1307_v9 = vmax.f32 %v1305_v7, 0.0 }
 0x6b9   :  { %v1306_v10 = vmax.f32 %v1304_v8, 0.0 }
 0x6ba   :  { %v1313_v11 = vsel %vm68_vm1, %v1307_v9, 0.0 }
 0x6bb   :  { %1314 = vadd.xlane.f32.xlu0 %v1313_v11  ;;  %v1310_v12 = vsel %vm68_vm1, %v1306_v10, 0.0 }
 0x6bc   :  { %1311 = vadd.xlane.f32.xlu1 %v1310_v12 }
 0x748   :  { %v1315_v14 = vpop.xlane.xlu0 %1314 }
 0x749   :  { %v1317_v13 = vmul.f32 0.03125, %v1315_v14  ;;  %v1312_v15 = vpop.xlane.xlu1 %1311 }
 0x74a   :  { %v1316_v16 = vmul.f32 0.03125, %v1312_v15 }
 0x74b   :  { %v1319_v60 = vsub.f32 %v1307_v9, %v1317_v13 }
 0x74c   :  { %v1318_v17 = vsub.f32 %v1306_v10, %v1316_v16 }
 0x74d   :  { %v1321_v18 = vmul.f32 %v1319_v60, %v1319_v60 }
 0x74e   :  { %v1320_v63 = vmul.f32 %v1318_v17, %v1318_v17 }
 0x74f   :  { %v1325_v19 = vsel %vm68_vm1, %v1321_v18, 0.0 }
 0x750   :  { %1326 = vadd.xlane.f32.xlu0 %v1325_v19  ;;  %v1322_v20 = vsel %vm68_vm1, %v1320_v63, 0.0 }
 0x751   :  { %1323 = vadd.xlane.f32.xlu1 %v1322_v20 }
 0x7dd   :  { %v1327_v21 = vpop.xlane.xlu0 %1326 }
 0x7de   :  { %v1329_v23 = vmul.f32 0.03125, %v1327_v21  ;;  %v1324_v25 = vpop.xlane.xlu1 %1323 }
 0x7df   :  { %v1328_v26 = vmul.f32 0.03125, %v1324_v25 }
 0x7e0   :  { %v1331_v28 = vadd.f32 1e-06, %v1329_v23 }
 0x7e1   :  { %v1330_v29 = vadd.f32 1e-06, %v1328_v26 }
 0x7e2   :  { %1828 = vrsqrt.f32 %v1331_v28 }
 0x7e3   :  { %1830 = vrsqrt.f32 %v1330_v29 }
 0x7ec   :  { %v1829_v30 = vpop.eup %1828 }
 0x7ed   :  { %v1831_v27 = vpop.eup %1830  ;;  %v1335_v33 = vmul.f32 %v1829_v30, %v1319_v60 }
 0x7ee   :  { %v1334_v34 = vmul.f32 %v1831_v27, %v1318_v17 }
 0x7ef   :  { %v1343_v36 = vmul.f32 %v1399_v31, %v1335_v33 }
 0x7f0   :  { %v1342_v37 = vmul.f32 %v1399_v31, %v1334_v34 }
 0x7f1   :  { %v1351_v24 = vadd.f32 %v1400_v35, %v1343_v36 }
 0x7f2   :  { %v1350_v38 = vadd.f32 %v1400_v35, %v1342_v37 }
 0x7f3   :  { %1353 = vst.msk [vmem:[#allocation2 + $0x8] sm:$0xff] %vm68_vm1, %v1351_v24 }
 0x7f4   :  { %1352 = vst.msk [vmem:[#allocation2] sm:$0xff] %vm68_vm1, %v1350_v38 }
 0x7f5   :  { %1843 = shalt.err (!%p1840_p4)
}
 0x7f6   :  { %s1844_s24 = scalar_lea.hbm %s2249_s14, 256 }
 0x7f7   :  { %p1845_p5 = scmp.ne.s32.totalorder %s2249_s14, %s1844_s24  ;;  %p1848_p6 = scmp.lt.u32.totalorder %s1844_s24, %s2249_s14 }
 0x7f9   :  { %p1850_p7 = pnand %p1848_p6, %p1845_p5 }
 0x7fb   :  { %1853 = shalt.err (!%p1850_p7)
}
 0x7fc   :  { %s1865_s27 = smov 128   ;;  %s1866_s1 = smov 8  }
 0x7fd   :  { %1365 = dma.vmem_to_hbm [thread:$0]  %s1360_s22, 256, %s2249_s14, [#allocation3], %s1865_s27, %s1865_s27, %s1866_s1  }
 0x7fe   :  { %1854 = dma.done.wait [#allocation3], 256  }
 0x7ff   :  { %1855 = vsyncadd [#allocation3], 4294967040 }
 0x800   :  { %1369 = vsyncpa [#allocation3], 1 }

</bundles_post_ra>
